<compile_context>
chip_gen: v5e
topology: v5e:2x2
jax: 0.10.0
libtpu: 0.0.40
codegen_flags: <defaults>
</compile_context>

<pallas_src>
import functools
import math

import jax
import jax.numpy as jnp
from jax.experimental import pallas as pl
from jax.experimental.pallas import tpu as pltpu

_MiB = 1024 * 1024


def _tpu_vmem_capacity_bytes():
    try:
        return int(pltpu.get_tpu_info().vmem_capacity_bytes)
    except Exception:
        return 128 * _MiB  # v5e/v6e value; conservative fallback if the query fails.


def _tpu_num_tensorcores():
    try:
        info = pltpu.get_tpu_info()
        for attr in ("tensorcores_per_chip", "num_tensorcores", "num_cores"):
            v = getattr(info, attr, None)
            if v:
                return max(1, int(v))
    except Exception:
        pass
    return 1


def _pick_seq_block(dim, target, quantum=256):
    """Largest divisor of `dim` that is <= target, preferring MXU-friendly multiples of
    `quantum` (256 for v6e/v7x), then 128 (v5e MXU), then 8 (sublane rule); falls back
    to the full dim (always a legal block)."""
    if dim <= target:
        return dim
    for q in (quantum, 128, 8):
        if q > target:
            continue
        for t in range(min(target, dim), q - 1, -1):
            if dim % t == 0 and t % q == 0:
                return t
    return dim


def _pick_batch_block(B, S):
    """Fold a few batch elements into one grid step only when the per-batch q tile is
    tiny (amortizes the ~0.35us per-step overhead), capped so a grid step does not turn
    into a long chain of serialized micro-matmuls."""
    if S >= 128:
        return 1
    want = min(B, max(1, 256 // max(S, 1)), 8)
    for t in range(want, 0, -1):
        if B % t == 0:
            return t
    return 1


def _vmem_footprint_bytes(bblk, tq, tkv, D, q_bytes, kv_bytes, out_bytes, comp_bytes):
    """Rough per-step VMEM working set: double-buffered Q/K/V/O tiles + persistent
    scratch (m, l, f32 acc, scaled-Q) + live (tq, tkv) f32 score/p temporaries."""
    pipe = 2 * bblk * (tq * D * q_bytes + 2 * tkv * D * kv_bytes + tq * D * out_bytes)
    scratch = bblk * tq * (2 * 4 + D * 4 + D * comp_bytes)
    temps = bblk * tq * tkv * (4 + 4 + comp_bytes)
    return pipe + scratch + temps


def _flash_attn_kernel(q_ref, k_ref, v_ref, o_ref, m_sc, l_sc, acc_sc, qs_sc,
                       *, scale, compute_dtype, exact_div):
    kv_idx = pl.program_id(2)

    @pl.when(kv_idx == 0)
    def _init():
        m_sc[...] = jnp.full_like(m_sc, -jnp.inf)
        l_sc[...] = jnp.zeros_like(l_sc)
        acc_sc[...] = jnp.zeros_like(acc_sc)
        # Hoisted out of the KV loop: fold 1/sqrt(d_k) into Q and cast to the MXU
        # compute dtype once per (batch, q-tile); the Q block is resident across kv.
        qs_sc[...] = (q_ref[...].astype(jnp.float32) * scale).astype(compute_dtype)

    q = qs_sc[...]                               # (bblk, tq, D)  compute_dtype
    k = k_ref[...].astype(compute_dtype)         # (bblk, tkv, D) (no-op if pre-cast)
    v = v_ref[...].astype(compute_dtype)         # (bblk, tkv, D)

    # scores: contract the last dims directly (no explicit transpose); operands hit the
    # MXU in compute_dtype (bf16 by default), accumulation is f32.
    s = jnp.einsum("bqd,bkd->bqk", q, k,
                   preferred_element_type=jnp.float32)   # (bblk, tq, tkv) f32

    # Online (flash) softmax update; statistics stay f32.
    m_prev = m_sc[...]
    m_new = jnp.maximum(m_prev, jnp.max(s, axis=-1, keepdims=True))
    alpha = jnp.exp(m_prev - m_new)
    p = jnp.exp(s - m_new)                       # (bblk, tq, tkv) f32

    l_sc[...] = alpha * l_sc[...] + jnp.sum(p, axis=-1, keepdims=True)
    acc_sc[...] = alpha * acc_sc[...] + jnp.einsum(
        "bqk,bkd->bqd", p.astype(compute_dtype), v,
        preferred_element_type=jnp.float32)
    m_sc[...] = m_new

    @pl.when(kv_idx == pl.num_programs(2) - 1)
    def _finalize():
        if exact_div:
            out = acc_sc[...] / l_sc[...]                      # exact for f32 outputs
        else:
            out = acc_sc[...] * pl.reciprocal(l_sc[...], approx=True)  # EUP slot
        o_ref[...] = out.astype(o_ref.dtype)


def dot_attention(Q, K, V, *, block_q=1024, block_kv=512, block_b=None,
                  compute_dtype=jnp.bfloat16):
    """softmax(Q K^T / sqrt(d_k)) @ V, batched over the leading dim."""
    B, S, D = Q.shape
    assert K.shape == (B, S, D) and V.shape == (B, S, D)
    out_dtype = Q.dtype
    compute_dtype = jnp.dtype(compute_dtype)

    # Generation-aware VMEM budget: ~96 MiB scoped on v5e/v6e (128 MiB physical),
    # ~48 MiB on v7x (64 MiB physical).
    vmem_cap = _tpu_vmem_capacity_bytes()
    vmem_limit = min((3 * vmem_cap) // 4, 96 * _MiB)
    budget = (9 * vmem_limit) // 10

    tq = _pick_seq_block(S, block_q)
    tkv = _pick_seq_block(S, block_kv)
    bblk = block_b if block_b is not None else _pick_batch_block(B, S)
    assert B % bblk == 0 and S % tq == 0 and S % tkv == 0

    q_bytes = jnp.dtype(Q.dtype).itemsize
    kv_bytes = compute_dtype.itemsize          # K/V cast at the wrapper boundary below
    out_bytes = jnp.dtype(out_dtype).itemsize
    comp_bytes = compute_dtype.itemsize

    # Shrink tiles until the working set fits the budget (mandatory on v7x's 64 MiB).
    while _vmem_footprint_bytes(bblk, tq, tkv, D, q_bytes, kv_bytes, out_bytes,
                                comp_bytes) > budget:
        if tq >= tkv and tq > 256:
            new = _pick_seq_block(S, tq // 2)
            if new < tq:
                tq = new
                continue
        if tkv > 256:
            new = _pick_seq_block(S, tkv // 2)
            if new < tkv:
                tkv = new
                continue
        if bblk > 1:
            nxt = 1
            for t in range(bblk - 1, 0, -1):
                if B % t == 0:
                    nxt = t
                    break
            bblk = nxt
            continue
        break

    # v7x only: make sure both TensorCores get at least one parallel grid step, as long
    # as that does not shrink the q tile below an MXU-friendly 256.
    n_cores = min(_tpu_num_tensorcores(), 2)
    if n_cores > 1:
        while (B // bblk) * (S // tq) < n_cores and tq > 256:
            new = _pick_seq_block(S, tq // 2)
            if new >= tq:
                break
            tq = new

    # Cast K/V once at the boundary: MXU-native operands + halved K/V refetch bytes.
    if K.dtype != compute_dtype:
        K = K.astype(compute_dtype)
    if V.dtype != compute_dtype:
        V = V.astype(compute_dtype)

    scale = 1.0 / math.sqrt(D)
    grid = (B // bblk, S // tq, S // tkv)

    q_spec = pl.BlockSpec((bblk, tq, D), lambda b, qi, ki: (b, qi, 0))
    kv_spec = pl.BlockSpec((bblk, tkv, D), lambda b, qi, ki: (b, ki, 0))
    o_spec = pl.BlockSpec((bblk, tq, D), lambda b, qi, ki: (b, qi, 0))

    kernel = functools.partial(
        _flash_attn_kernel,
        scale=scale,
        compute_dtype=compute_dtype,
        exact_div=(jnp.dtype(out_dtype) == jnp.float32),
    )

    n_q_tiles = S // tq
    cost = pl.CostEstimate(
        flops=4 * B * S * S * D,                     # QK^T + PV
        transcendentals=B * S * S,                   # exp
        bytes_accessed=(B * S * D * (q_bytes + out_bytes)
                        + 2 * B * S * D * kv_bytes * n_q_tiles),
    )

    return pl.pallas_call(
        kernel,
        out_shape=jax.ShapeDtypeStruct((B, S, D), out_dtype),
        grid_spec=pltpu.PrefetchScalarGridSpec(
            num_scalar_prefetch=0,
            grid=grid,
            in_specs=[q_spec, kv_spec, kv_spec],
            out_specs=o_spec,
            scratch_shapes=[
                pltpu.VMEM((bblk, tq, 1), jnp.float32),    # running max
                pltpu.VMEM((bblk, tq, 1), jnp.float32),    # running denom
                pltpu.VMEM((bblk, tq, D), jnp.float32),    # f32 output accumulator
                pltpu.VMEM((bblk, tq, D), compute_dtype),  # scaled + cast Q tile
            ],
        ),
        compiler_params=pltpu.CompilerParams(
            # KV (reduction) axis last + "arbitrary"; batch/q-tile axes parallel so
            # v7x's two TensorCores can shard them.
            dimension_semantics=("parallel", "parallel", "arbitrary"),
            vmem_limit_bytes=vmem_limit,
        ),
        cost_estimate=cost,
    )(Q, K, V)


def _reference(Q, K, V):
    d_k = Q.shape[-1]
    scores = jnp.einsum("bqd,bkd->bqk", Q, K) / math.sqrt(d_k)
    p = jax.nn.softmax(scores, axis=-1)
    return jnp.einsum("bqk,bkd->bqd", p, V)


if __name__ == "__main__":
    key = jax.random.PRNGKey(0)

    # Case 1: module-sized small shapes (single tile per batch block).
    kq, kk, kv = jax.random.split(key, 3)
    B, S, D = 2, 8, 32
    Q = jax.random.normal(kq, (B, S, D), dtype=jnp.float32)
    K = jax.random.normal(kk, (B, S, D), dtype=jnp.float32)
    V = jax.random.normal(kv, (B, S, D), dtype=jnp.float32)

    out = dot_attention(Q, K, V)
    jax.block_until_ready(out)
    ref = _reference(Q, K, V)
    assert out.shape == (B, S, D)
    assert jnp.allclose(out, ref, atol=2e-2, rtol=2e-2), "mismatch vs reference (case 1)"

    # Case 2: still small, but forced into multiple q/kv tiles to exercise the
    # online-softmax accumulation path across KV grid steps.
    kq2, kk2, kv2 = jax.random.split(jax.random.PRNGKey(1), 3)
    B2, S2, D2 = 2, 32, 32
    Q2 = jax.random.normal(kq2, (B2, S2, D2), dtype=jnp.float32)
    K2 = jax.random.normal(kk2, (B2, S2, D2), dtype=jnp.float32)
    V2 = jax.random.normal(kv2, (B2, S2, D2), dtype=jnp.float32)

    out2 = dot_attention(Q2, K2, V2, block_q=8, block_kv=8)
    jax.block_until_ready(out2)
    ref2 = _reference(Q2, K2, V2)
    assert out2.shape == (B2, S2, D2)
    assert jnp.allclose(out2, ref2, atol=2e-2, rtol=2e-2), "mismatch vs reference (case 2)"

    print("KERNEL_OK")
</pallas_src>

<mosaic_0001>
module attributes {stable_mosaic.version = 11 : i64} {
  func.func @_flash_attn_kernel(%arg0: i32, %arg1: i32, %arg2: i32, %arg3: memref<2x8x32xf32, #tpu.memory_space<vmem>>, %arg4: memref<2x8x32xbf16, #tpu.memory_space<vmem>>, %arg5: memref<2x8x32xbf16, #tpu.memory_space<vmem>>, %arg6: memref<2x8x32xf32, #tpu.memory_space<vmem>>, %arg7: memref<2x8x1xf32, #tpu.memory_space<vmem>>, %arg8: memref<2x8x1xf32, #tpu.memory_space<vmem>>, %arg9: memref<2x8x32xf32, #tpu.memory_space<vmem>>, %arg10: memref<2x8x32xbf16, #tpu.memory_space<vmem>>) attributes {dimension_semantics = [#tpu.dimension_semantics<parallel>, #tpu.dimension_semantics<parallel>, #tpu.dimension_semantics<arbitrary>], iteration_bounds = array<i64: 1, 1, 1>, scalar_prefetch = 0 : i64, scratch_operands = 4 : i64, tpu.core_type = #tpu.core_type<tc>, window_params = [{transform_indices = @transform_0, window_bounds = array<i64: 2, 8, 32>}, {transform_indices = @transform_1, window_bounds = array<i64: 2, 8, 32>}, {transform_indices = @transform_2, window_bounds = array<i64: 2, 8, 32>}, {transform_indices = @transform_3, window_bounds = array<i64: 2, 8, 32>}]} {
    %c0_i32 = arith.constant 0 : i32
    %0 = arith.cmpi eq, %arg2, %c0_i32 : i32
    %1 = arith.extui %0 : i1 to i32
    %c0_i32_0 = arith.constant 0 : i32
    %2 = arith.cmpi ne, %1, %c0_i32_0 : i32
    scf.if %2 {
      %cst_32 = arith.constant 0xFF800000 : f32
      %33 = vector.broadcast %cst_32 : f32 to vector<2x8x1xf32>
      %c0_33 = arith.constant 0 : index
      %c0_34 = arith.constant 0 : index
      %c0_35 = arith.constant 0 : index
      %34 = vector.load %arg7[%c0_33, %c0_34, %c0_35] : memref<2x8x1xf32, #tpu.memory_space<vmem>>, vector<2x8x1xf32>
      tpu.vector_store %arg7[%c0_33, %c0_34, %c0_35], %33 {strides = array<i32>} : memref<2x8x1xf32, #tpu.memory_space<vmem>>, vector<2x8x1xf32>,
      %cst_36 = arith.constant 0.000000e+00 : f32
      %35 = vector.broadcast %cst_36 : f32 to vector<2x8x1xf32>
      %c0_37 = arith.constant 0 : index
      %c0_38 = arith.constant 0 : index
      %c0_39 = arith.constant 0 : index
      %36 = vector.load %arg8[%c0_37, %c0_38, %c0_39] : memref<2x8x1xf32, #tpu.memory_space<vmem>>, vector<2x8x1xf32>
      tpu.vector_store %arg8[%c0_37, %c0_38, %c0_39], %35 {strides = array<i32>} : memref<2x8x1xf32, #tpu.memory_space<vmem>>, vector<2x8x1xf32>,
      %cst_40 = arith.constant 0.000000e+00 : f32
      %37 = vector.broadcast %cst_40 : f32 to vector<2x8x32xf32>
      %c0_41 = arith.constant 0 : index
      %c0_42 = arith.constant 0 : index
      %c0_43 = arith.constant 0 : index
      %38 = vector.load %arg9[%c0_41, %c0_42, %c0_43] : memref<2x8x32xf32, #tpu.memory_space<vmem>>, vector<2x8x32xf32>
      tpu.vector_store %arg9[%c0_41, %c0_42, %c0_43], %37 {strides = array<i32>} : memref<2x8x32xf32, #tpu.memory_space<vmem>>, vector<2x8x32xf32>,
      %c0_44 = arith.constant 0 : index
      %c0_45 = arith.constant 0 : index
      %c0_46 = arith.constant 0 : index
      %39 = vector.load %arg3[%c0_44, %c0_45, %c0_46] : memref<2x8x32xf32, #tpu.memory_space<vmem>>, vector<2x8x32xf32>
      %cst_47 = arith.constant 0.176776692 : f32
      %40 = vector.broadcast %cst_47 : f32 to vector<2x8x32xf32>
      %41 = arith.mulf %39, %40 : vector<2x8x32xf32>
      %42 = arith.truncf %41 : vector<2x8x32xf32> to vector<2x8x32xbf16>
      %c0_48 = arith.constant 0 : index
      %c0_49 = arith.constant 0 : index
      %c0_50 = arith.constant 0 : index
      %43 = vector.load %arg10[%c0_48, %c0_49, %c0_50] : memref<2x8x32xbf16, #tpu.memory_space<vmem>>, vector<2x8x32xbf16>
      tpu.vector_store %arg10[%c0_48, %c0_49, %c0_50], %42 {strides = array<i32>} : memref<2x8x32xbf16, #tpu.memory_space<vmem>>, vector<2x8x32xbf16>,
    } else {
    }
    %c0 = arith.constant 0 : index
    %c0_1 = arith.constant 0 : index
    %c0_2 = arith.constant 0 : index
    %3 = vector.load %arg10[%c0, %c0_1, %c0_2] : memref<2x8x32xbf16, #tpu.memory_space<vmem>>, vector<2x8x32xbf16>
    %c0_3 = arith.constant 0 : index
    %c0_4 = arith.constant 0 : index
    %c0_5 = arith.constant 0 : index
    %4 = vector.load %arg4[%c0_3, %c0_4, %c0_5] : memref<2x8x32xbf16, #tpu.memory_space<vmem>>, vector<2x8x32xbf16>
    %c0_6 = arith.constant 0 : index
    %c0_7 = arith.constant 0 : index
    %c0_8 = arith.constant 0 : index
    %5 = vector.load %arg5[%c0_6, %c0_7, %c0_8] : memref<2x8x32xbf16, #tpu.memory_space<vmem>>, vector<2x8x32xbf16>
    "tpu.trace_start"() <{level = 10 : i32, message = "bqd,bkd->bqk"}> : () -> ()
    %cst = arith.constant dense<0.000000e+00> : vector<2x8x8xf32>
    %6 = tpu.matmul %3, %4, %cst {dimension_numbers = #tpu.dot_dimension_numbers<[2], [2], [1], [1], [0, 0, 0, 1, 1, 1], [0], [0]>} : vector<2x8x32xbf16>, vector<2x8x32xbf16>, vector<2x8x8xf32> -> vector<2x8x8xf32>
    "tpu.trace_stop"() : () -> ()
    %c0_9 = arith.constant 0 : index
    %c0_10 = arith.constant 0 : index
    %c0_11 = arith.constant 0 : index
    %7 = vector.load %arg7[%c0_9, %c0_10, %c0_11] : memref<2x8x1xf32, #tpu.memory_space<vmem>>, vector<2x8x1xf32>
    %cst_12 = arith.constant dense<0xFF800000> : vector<2x8xf32>
    %8 = vector.multi_reduction <maximumf>, %6, %cst_12 [2] : vector<2x8x8xf32> to vector<2x8xf32>
    %9 = vector.shape_cast %8 : vector<2x8xf32> to vector<2x8x1xf32>
    %10 = arith.maximumf %7, %9 : vector<2x8x1xf32>
    %11 = arith.subf %7, %10 : vector<2x8x1xf32>
    %12 = math.exp %11 : vector<2x8x1xf32>
    %13 = vector.broadcast %10 : vector<2x8x1xf32> to vector<2x8x8xf32>
    %14 = arith.subf %6, %13 : vector<2x8x8xf32>
    %15 = math.exp %14 : vector<2x8x8xf32>
    %c0_13 = arith.constant 0 : index
    %c0_14 = arith.constant 0 : index
    %c0_15 = arith.constant 0 : index
    %16 = vector.load %arg8[%c0_13, %c0_14, %c0_15] : memref<2x8x1xf32, #tpu.memory_space<vmem>>, vector<2x8x1xf32>
    %17 = arith.mulf %12, %16 : vector<2x8x1xf32>
    %cst_16 = arith.constant dense<0.000000e+00> : vector<2x8xf32>
    %18 = vector.multi_reduction <add>, %15, %cst_16 [2] : vector<2x8x8xf32> to vector<2x8xf32>
    %19 = vector.shape_cast %18 : vector<2x8xf32> to vector<2x8x1xf32>
    %20 = arith.addf %17, %19 : vector<2x8x1xf32>
    %c0_17 = arith.constant 0 : index
    %c0_18 = arith.constant 0 : index
    %c0_19 = arith.constant 0 : index
    %21 = vector.load %arg8[%c0_17, %c0_18, %c0_19] : memref<2x8x1xf32, #tpu.memory_space<vmem>>, vector<2x8x1xf32>
    tpu.vector_store %arg8[%c0_17, %c0_18, %c0_19], %20 {strides = array<i32>} : memref<2x8x1xf32, #tpu.memory_space<vmem>>, vector<2x8x1xf32>,
    %c0_20 = arith.constant 0 : index
    %c0_21 = arith.constant 0 : index
    %c0_22 = arith.constant 0 : index
    %22 = vector.load %arg9[%c0_20, %c0_21, %c0_22] : memref<2x8x32xf32, #tpu.memory_space<vmem>>, vector<2x8x32xf32>
    %23 = vector.broadcast %12 : vector<2x8x1xf32> to vector<2x8x32xf32>
    %24 = arith.mulf %23, %22 : vector<2x8x32xf32>
    %25 = arith.truncf %15 : vector<2x8x8xf32> to vector<2x8x8xbf16>
    "tpu.trace_start"() <{level = 10 : i32, message = "bqk,bkd->bqd"}> : () -> ()
    %cst_23 = arith.constant dense<0.000000e+00> : vector<2x8x32xf32>
    %26 = tpu.matmul %25, %5, %cst_23 {dimension_numbers = #tpu.dot_dimension_numbers<[2], [1], [1], [2], [0, 0, 0, 1, 1, 2], [0], [0]>} : vector<2x8x8xbf16>, vector<2x8x32xbf16>, vector<2x8x32xf32> -> vector<2x8x32xf32>
    "tpu.trace_stop"() : () -> ()
    %27 = arith.addf %24, %26 : vector<2x8x32xf32>
    %c0_24 = arith.constant 0 : index
    %c0_25 = arith.constant 0 : index
    %c0_26 = arith.constant 0 : index
    %28 = vector.load %arg9[%c0_24, %c0_25, %c0_26] : memref<2x8x32xf32, #tpu.memory_space<vmem>>, vector<2x8x32xf32>
    tpu.vector_store %arg9[%c0_24, %c0_25, %c0_26], %27 {strides = array<i32>} : memref<2x8x32xf32, #tpu.memory_space<vmem>>, vector<2x8x32xf32>,
    %c0_27 = arith.constant 0 : index
    %c0_28 = arith.constant 0 : index
    %c0_29 = arith.constant 0 : index
    %29 = vector.load %arg7[%c0_27, %c0_28, %c0_29] : memref<2x8x1xf32, #tpu.memory_space<vmem>>, vector<2x8x1xf32>
    tpu.vector_store %arg7[%c0_27, %c0_28, %c0_29], %10 {strides = array<i32>} : memref<2x8x1xf32, #tpu.memory_space<vmem>>, vector<2x8x1xf32>,
    %c0_i32_30 = arith.constant 0 : i32
    %30 = arith.cmpi eq, %arg2, %c0_i32_30 : i32
    %31 = arith.extui %30 : i1 to i32
    %c0_i32_31 = arith.constant 0 : i32
    %32 = arith.cmpi ne, %31, %c0_i32_31 : i32
    scf.if %32 {
      %c0_32 = arith.constant 0 : index
      %c0_33 = arith.constant 0 : index
      %c0_34 = arith.constant 0 : index
      %33 = vector.load %arg9[%c0_32, %c0_33, %c0_34] : memref<2x8x32xf32, #tpu.memory_space<vmem>>, vector<2x8x32xf32>
      %c0_35 = arith.constant 0 : index
      %c0_36 = arith.constant 0 : index
      %c0_37 = arith.constant 0 : index
      %34 = vector.load %arg8[%c0_35, %c0_36, %c0_37] : memref<2x8x1xf32, #tpu.memory_space<vmem>>, vector<2x8x1xf32>
      %35 = vector.broadcast %34 : vector<2x8x1xf32> to vector<2x8x32xf32>
      %36 = arith.divf %33, %35 : vector<2x8x32xf32>
      %c0_38 = arith.constant 0 : index
      %c0_39 = arith.constant 0 : index
      %c0_40 = arith.constant 0 : index
      %37 = vector.load %arg6[%c0_38, %c0_39, %c0_40] : memref<2x8x32xf32, #tpu.memory_space<vmem>>, vector<2x8x32xf32>
      tpu.vector_store %arg6[%c0_38, %c0_39, %c0_40], %36 {strides = array<i32>} : memref<2x8x32xf32, #tpu.memory_space<vmem>>, vector<2x8x32xf32>,
    } else {
    }
    return
  }
  func.func @transform_0(%arg0: i32, %arg1: i32, %arg2: i32) -> (i32, i32, i32) {
    %c0_i32 = arith.constant 0 : i32
    %c0_i32_0 = arith.constant 0 : i32
    return %arg0, %arg1, %c0_i32 : i32, i32, i32
  }
  func.func @transform_1(%arg0: i32, %arg1: i32, %arg2: i32) -> (i32, i32, i32) {
    %c0_i32 = arith.constant 0 : i32
    %c0_i32_0 = arith.constant 0 : i32
    return %arg0, %arg2, %c0_i32 : i32, i32, i32
  }
  func.func @transform_2(%arg0: i32, %arg1: i32, %arg2: i32) -> (i32, i32, i32) {
    %c0_i32 = arith.constant 0 : i32
    %c0_i32_0 = arith.constant 0 : i32
    return %arg0, %arg2, %c0_i32 : i32, i32, i32
  }
  func.func @transform_3(%arg0: i32, %arg1: i32, %arg2: i32) -> (i32, i32, i32) {
    %c0_i32 = arith.constant 0 : i32
    %c0_i32_0 = arith.constant 0 : i32
    return %arg0, %arg1, %c0_i32 : i32, i32, i32
  }
}

</mosaic_0001>

<bundles_post_ra>
// kernel: tpu_custom_call.1
= control target key start
LH: loop header
LB: loop body
LE: loop exit
PB: predicated region body
PF: predicated region fallthrough
CT: control target
= control target key end

     0   :  { %8 = vsyncpa [#allocation7], 0  ;;  %s512_s0 = inlined_call_operand.hbm [shape: f32[2,8,32], index: 0, kind: input, shape index: {}]   ;;  %s513_s1 = inlined_call_operand.hbm [shape: bf16[2,8,32], index: 1, kind: input, shape index: {}]   ;;  %s514_s2 = inlined_call_operand.hbm [shape: bf16[2,8,32], index: 2, kind: input, shape index: {}]   ;;  %s515_s3 = inlined_call_operand.hbm [shape: f32[2,8,32], index: 3, kind: output, shape index: {}]  }
   0x1   :  { %9 = vsyncpa [#allocation10], 0  ;;  %s28_s14 = sshll.u32 %s513_s1, 4  ;;  %s29_s14 = int_to_ptr.hbm [resolvable:$true] %s28_s14 }
   0x2   :  { %10 = vsyncpa [#allocation8], 0  ;;  %s439_s15 = smov [#allocation9]   ;;  %s15_s19 = sshll.u32 %s512_s0, 4  ;;  %s16_s19 = int_to_ptr.hbm [resolvable:$true] %s15_s19 }
   0x3   :  { %s30_s16 = sshll.u32 %s439_s15, 4  ;;  %s440_s20 = smov 64   ;;  %s31_s16 = int_to_ptr.vmem [resolvable:$true] %s30_s16 }
   0x4   :  { %s441_s21 = smov 4   ;;  %s442_s22 = smov [#allocation6]  }
   0x5   :  { %36 = dma.hbm_to_vmem [thread:$0]  %s29_s14, 128, %s31_s16, [#allocation10], %s440_s20, %s440_s20, %s441_s21  }
   0x6   :  { %s17_s23 = sshll.u32 %s442_s22, 4  ;;  %s443_s24 = smov 128   ;;  %s18_s23 = int_to_ptr.vmem [resolvable:$true] %s17_s23 }
   0x7   :  { %s444_s25 = smov 8   ;;  %s41_s27 = sshll.u32 %s514_s2, 4  ;;  %s42_s27 = int_to_ptr.hbm [resolvable:$true] %s41_s27 }
   0x8   :  { %23 = dma.hbm_to_vmem [thread:$0]  %s16_s19, 256, %s18_s23, [#allocation7], %s443_s24, %s443_s24, %s444_s25  }
   0x9   :  { %s445_s28 = smov [#allocation11]  }
   0xa   :  { %s43_s0 = sshll.u32 %s445_s28, 4  ;;  %s44_s0 = int_to_ptr.vmem [resolvable:$true] %s43_s0 }
   0xb   :  { %49 = dma.hbm_to_vmem [thread:$0]  %s42_s27, 128, %s44_s0, [#allocation10], %s440_s20, %s440_s20, %s441_s21  }
   0xc   :  { %433 = dma.done.wait [#allocation7], 256  }
   0xd   :  { %434 = vsyncadd [#allocation7], 4294967040 }
   0xe   :  { %435 = dma.done.wait [#allocation10], 256  }
   0xf   :  { %436 = vsyncadd [#allocation10], 4294967040  ;;  %vm72_vm0 = vcmask 261120   ;;  %v86_v0 = vld [vmem:[#allocation9] sm:$0xf]  ;;  %v75_v2 = vld [vmem:[#allocation6] sm:$0xff] }
  0x10   :  { %v87_v1 = vld [vmem:[#allocation9 + $0x4] sm:$0xf]  ;;  %v95_v3 = vsel %vm72_vm0, %v86_v0, 0  ;;  %v77_v5 = vmul.f32 0.17677669, %v75_v2  ;;  %v76_v6 = vld [vmem:[#allocation6 + $0x8] sm:$0xff] }
  0x11   :  { %v114_v4 = vsel %vm72_vm0, %v87_v1, 0  ;;  %104 = vmatpush.bf16.xpose.msra.mxu0 %v95_v3  ;;  %vm81_vm1 = vcmask 257024   ;;  %v78_v7 = vmul.f32 0.17677669, %v76_v6  ;;  %vm67_vm2 = vcmask 7168   ;;  %s449_s2 = smov [#allocation12]  }
  0x12   :  { %123 = vmatpush.bf16.xpose.msra.mxu1 %v114_v4  ;;  %v79_v8 = vpack.c.bf16 %v77_v5, %v77_v5  ;;  %v446_v12 = vmov -inf   ;;  %vm131_vm3 = vcmask 64512   ;;  %v447_v19 = vmov 0   ;;  %v88_v29 = vld [vmem:[#allocation11] sm:$0xf]  ;;  %s291_s29 = sshll.u32 %s449_s2, 4  ;;  %s292_s29 = int_to_ptr.vmem [resolvable:$true] %s291_s29 }
  0x13   :  { %v80_v9 = vpack.c.bf16 %v78_v7, %v78_v7  ;;  %68 = vst.msk [vmem:[#allocation2] sm:$0xff] %vm67_vm2, %v446_v12  ;;  %322 = vset.pattern.permute.xlu1 %v447_v19  ;;  %324 = vset.pattern.permute.xlu2 %v447_v19  ;;  %v448_v20 = vmov 0.0   ;;  %vm196_vm4 = vcmask 1043456   ;;  %v89_v31 = vld [vmem:[#allocation11 + $0x4] sm:$0xf]  ;;  %s293_s5 = sshll.u32 %s515_s3, 4  ;;  %s294_s5 = int_to_ptr.hbm [resolvable:$true] %s293_s5 }
  0x14   :  { %82 = vst.msk [vmem:[#allocation5] sm:$0xf] %vm81_vm1, %v79_v8  ;;  %323 = vset.pattern.permute.xlu0 %v447_v19  ;;  %v198_v30 = vsel %vm196_vm4, %v88_v29, 0  ;;  %v217_v32 = vsel %vm196_vm4, %v89_v31, 0 }
  0x15   :  { %83 = vst.msk [vmem:[#allocation5 + $0x4] sm:$0xf] %vm81_vm1, %v80_v9  ;;  %207 = vmatpush.bf16.msra.mxu2 %v198_v30  ;;  %226 = vmatpush.bf16.msra.mxu3 %v217_v32 }
  0x16   :  { %69 = vst.msk [vmem:[#allocation2 + $0x8] sm:$0xff] %vm67_vm2, %v446_v12 }
  0x17   :  { %70 = vst.msk [vmem:[#allocation3] sm:$0xff] %vm67_vm2, %v448_v20 }
  0x18   :  { %73 = vst.msk [vmem:[#allocation4] sm:$0xff] %vm72_vm0, %v448_v20 }
  0x19   :  { %71 = vst.msk [vmem:[#allocation3 + $0x8] sm:$0xff] %vm67_vm2, %v448_v20 }
  0x1a   :  { %74 = vst.msk [vmem:[#allocation4 + $0x8] sm:$0xff] %vm72_vm0, %v448_v20  ;;  %v129_v21 = vld [vmem:[#allocation2] sm:$0xff] }
  0x1b   :  { %v84_v10 = vld [vmem:[#allocation5] sm:$0xf] }
  0x1c   :  { %307 = vmatmul.msk.bf16.vlgmr.msra.gmra.mxu0 %vm72_vm0, %v84_v10  ;;  %v85_v11 = vld [vmem:[#allocation5 + $0x4] sm:$0xf] }
  0x1d   :  { %308 = vmatmul.msk.bf16.vlgmr.msra.gmra.mxu1 %vm72_vm0, %v85_v11  ;;  %v130_v25 = vld [vmem:[#allocation2 + $0x8] sm:$0xff] }
  0x1e   :  { %v162_v48 = vld [vmem:[#allocation3] sm:$0xff] }
  0x1f   :  { %v177_v58 = vld [vmem:[#allocation4] sm:$0xff] }
  0x20   :  { %v163_v53 = vld [vmem:[#allocation3 + $0x8] sm:$0xff] }
  0x21   :  { %v178_v12 = vld [vmem:[#allocation4 + $0x8] sm:$0xff] }
  0x99   :  { %v106_v13 = vpop.f32.mrf.mxu0 }
  0x9a   :  { %v125_v14 = vpop.f32.mrf.mxu1  ;;  %v132_v15 = vsel %vm131_vm3, %v106_v13, -inf }
  0x9b   :  { %133 = vmax.xlane.f32.xlu0 %v132_v15  ;;  %v135_v16 = vsel %vm131_vm3, %v125_v14, -inf }
  0xa1   :  { %v108_v17 = vpop.f32.mrf.mxu0 }
  0xa2   :  { %v127_v18 = vpop.f32.mrf.mxu1 }
  0xa3   :  { %136 = vmax.xlane.f32.xlu0 %v135_v16 }
 0x10e   :  { %v134_v22 = vpop.xlane.xlu0 %133 }
 0x10f   :  { %v138_v23 = vmax.f32 %v129_v21, %v134_v22 }
 0x111   :  { %v140_v24 = vsub.f32 %v129_v21, %v138_v23  ;;  %236 = vst.msk [vmem:[#allocation2] sm:$0xff] %vm67_vm2, %v138_v23  ;;  %148 = vperm.xlu1 %322, %v138_v23  }
 0x113   :  { %v142_v45 = vmul.f32 1.442695, %v140_v24 }
 0x116   :  { %v137_v26 = vpop.xlane.xlu0 %136 }
 0x117   :  { %v139_v27 = vmax.f32 %v130_v25, %v137_v26 }
 0x119   :  { %v141_v28 = vsub.f32 %v130_v25, %v139_v27  ;;  %237 = vst.msk [vmem:[#allocation2 + $0x8] sm:$0xff] %vm67_vm2, %v139_v27  ;;  %153 = vperm.xlu1 %322, %v139_v27  }
 0x11b   :  { %v144_v47 = vmul.f32 1.442695, %v141_v28 }
 0x183   :  { %v149_v33 = vpop.permute.xlu1 %148 }
 0x184   :  { %v156_v34 = vsub.f32 %v106_v13, %v149_v33 }
 0x186   :  { %v158_v35 = vmul.f32 1.442695, %v156_v34 }
 0x188   :  { %325 = vpow2.f32 %v158_v35 }
 0x18b   :  { %v154_v36 = vpop.permute.xlu1 %153 }
 0x18c   :  { %v157_v37 = vsub.f32 %v125_v14, %v154_v36 }
 0x18e   :  { %v326_v38 = vpop.eup %325  ;;  %v160_v39 = vmul.f32 1.442695, %v157_v37 }
 0x18f   :  { %v166_v40 = vsel %vm131_vm3, %v326_v38, 0.0  ;;  %v191_v41 = vpack.c.bf16 %v326_v38, %v326_v38 }
 0x190   :  { %327 = vpow2.f32 %v160_v39  ;;  %167 = vadd.xlane.f32.xlu2 %v166_v40 }
 0x191   :  { %309 = vmatmul.msk.bf16.vlgmr.msra.gmra.mxu2 %vm131_vm3, %v191_v41  ;;  %329 = vpow2.f32 %v142_v45 }
 0x192   :  { %331 = vpow2.f32 %v144_v47 }
 0x196   :  { %v328_v42 = vpop.eup %327 }
 0x197   :  { %v169_v43 = vsel %vm131_vm3, %v328_v42, 0.0  ;;  %v192_v44 = vpack.c.bf16 %v328_v42, %v328_v42  ;;  %v330_v46 = vpop.eup %329 }
 0x198   :  { %170 = vadd.xlane.f32.xlu2 %v169_v43  ;;  %v164_v49 = vmul.f32 %v330_v46, %v162_v48  ;;  %v332_v52 = vpop.eup %331 }
 0x199   :  { %310 = vmatmul.msk.bf16.vlgmr.msra.gmra.mxu3 %vm131_vm3, %v192_v44  ;;  %v165_v54 = vmul.f32 %v332_v52, %v163_v53 }
 0x1b0   :  { %181 = vperm.xlu2 %324, %v330_v46  }
 0x203   :  { %v168_v50 = vpop.xlane.xlu2 %167 }
 0x204   :  { %v172_v51 = vadd.f32 %v168_v50, %v164_v49 }
 0x206   :  { %175 = vst.msk [vmem:[#allocation3] sm:$0xff] %vm67_vm2, %v172_v51 }
 0x20b   :  { %v171_v55 = vpop.xlane.xlu2 %170 }
 0x20c   :  { %v173_v56 = vadd.f32 %v171_v55, %v165_v54 }
 0x20d   :  { %v243_v57 = vld [vmem:[#allocation3] sm:$0xff] }
 0x20e   :  { %176 = vst.msk [vmem:[#allocation3 + $0x8] sm:$0xff] %vm67_vm2, %v173_v56  ;;  %247 = vperm.xlu0 %323, %v243_v57  }
 0x213   :  { %v182_v59 = vpop.permute.xlu2 %181 }
 0x214   :  { %v189_v60 = vmul.f32 %v182_v59, %v177_v58  ;;  %v209_v61 = vpop.f32.mrf.mxu2 }
 0x215   :  { %v244_v62 = vld [vmem:[#allocation3 + $0x8] sm:$0xff] }
 0x216   :  { %v232_v63 = vadd.f32 %v209_v61, %v189_v60  ;;  %252 = vperm.xlu1 %322, %v244_v62  }
 0x218   :  { %234 = vst.msk [vmem:[#allocation4] sm:$0xff] %vm72_vm0, %v232_v63 }
 0x21c   :  { %v211_v0 = vpop.f32.mrf.mxu2  ;;  %v228_v1 = vpop.f32.mrf.mxu3 }
 0x21e   :  { %186 = vperm.xlu1 %322, %v332_v52  }
 0x21f   :  { %v241_v18 = vld [vmem:[#allocation4] sm:$0xff] }
 0x224   :  { %v230_v2 = vpop.f32.mrf.mxu3 }
 0x280   :  { %v248_v3 = vpop.permute.xlu0 %247 }
 0x281   :  { %333 = vrcp.f32 %v248_v3  ;;  %v266_v8 = vand.u32 2147483648, %v248_v3  ;;  %v264_v10 = vand.u32 2147483647, %v248_v3  ;;  %vm260_vm6 = vweird.f32 %v248_v3 }
 0x283   :  { %v267_v14 = vor.u32 1.1754944e-38, %v266_v8  ;;  %vm265_vm8 = vcmp.eq.f32.partialorder %v264_v10, 8.507059e+37 }
 0x287   :  { %v334_v4 = vpop.eup %333 }
 0x288   :  { %v256_v5 = vmul.f32 %v334_v4, %v248_v3  ;;  %v253_v6 = vpop.permute.xlu1 %252  ;;  %vm261_vm5 = vweird.f32 %v334_v4 }
 0x289   :  { %335 = vrcp.f32 %v253_v6  ;;  %vm262_vm7 = vmor %vm260_vm6, %vm261_vm5  ;;  %v281_v26 = vand.u32 2147483648, %v253_v6  ;;  %vm275_vm10 = vweird.f32 %v253_v6  ;;  %v279_v27 = vand.u32 2147483647, %v253_v6 }
 0x28a   :  { %v257_v7 = vsub.f32 1.0, %v256_v5 }
 0x28b   :  { %v282_v29 = vor.u32 1.1754944e-38, %v281_v26  ;;  %vm280_vm12 = vcmp.eq.f32.partialorder %v279_v27, 8.507059e+37 }
 0x28c   :  { %v258_v9 = vmul.f32 %v334_v4, %v257_v7 }
 0x28e   :  { %v259_v11 = vadd.f32 %v334_v4, %v258_v9 }
 0x28f   :  { %v336_v13 = vpop.eup %335 }
 0x290   :  { %v263_v15 = vsel %vm262_vm7, %v334_v4, %v259_v11  ;;  %v271_v16 = vmul.f32 %v336_v13, %v253_v6  ;;  %v187_v17 = vpop.permute.xlu1 %186  ;;  %vm276_vm9 = vweird.f32 %v336_v13 }
 0x291   :  { %v268_v19 = vsel %vm265_vm8, %v267_v14, %v263_v15  ;;  %v190_v20 = vmul.f32 %v187_v17, %v178_v12  ;;  %vm277_vm11 = vmor %vm275_vm10, %vm276_vm9 }
 0x292   :  { %v269_v21 = vmul.f32 %v268_v19, %v241_v18  ;;  %v272_v22 = vsub.f32 1.0, %v271_v16 }
 0x293   :  { %v233_v23 = vadd.f32 %v228_v1, %v190_v20 }
 0x294   :  { %285 = vst.msk [vmem:[#allocation12] sm:$0xff] %vm72_vm0, %v269_v21  ;;  %v273_v24 = vmul.f32 %v336_v13, %v272_v22 }
 0x295   :  { %235 = vst.msk [vmem:[#allocation4 + $0x8] sm:$0xff] %vm72_vm0, %v233_v23 }
 0x296   :  { %v274_v25 = vadd.f32 %v336_v13, %v273_v24 }
 0x298   :  { %v278_v28 = vsel %vm277_vm11, %v336_v13, %v274_v25 }
 0x299   :  { %v283_v31 = vsel %vm280_vm12, %v282_v29, %v278_v28 }
 0x29c   :  { %v242_v30 = vld [vmem:[#allocation4 + $0x8] sm:$0xff] }
 0x29d   :  { %v284_v32 = vmul.f32 %v283_v31, %v242_v30 }
 0x29f   :  { %286 = vst.msk [vmem:[#allocation12 + $0x8] sm:$0xff] %vm72_vm0, %v284_v32 }
 0x2a0   :  { %299 = dma.vmem_to_hbm [thread:$0]  %s292_s29, 256, %s294_s5, [#allocation8], %s443_s24, %s443_s24, %s444_s25  }
 0x2a1   :  { %437 = dma.done.wait [#allocation8], 256  }
 0x2a2   :  { %438 = vsyncadd [#allocation8], 4294967040 }
 0x2a3   :  { %304 = vsyncpa [#allocation7], 1 }
 0x2a4   :  { %305 = vsyncpa [#allocation10], 1 }
 0x2a5   :  { %306 = vsyncpa [#allocation8], 1 }

</bundles_post_ra>
